<compile_context>
chip_gen: v6e
topology: v6e:2x2x1
jax: 0.10.0
libtpu: 0.0.40
codegen_flags: <defaults>
</compile_context>

<pallas_src>
import functools
import math

import jax
import jax.numpy as jnp
from jax.experimental import pallas as pl
from jax.experimental.pallas import tpu as pltpu


def _round_up(x, m):
    return ((x + m - 1) // m) * m


# --------------------------------------------------------------------------
# Generic linear (fc2, res_fc)
# --------------------------------------------------------------------------
def _linear_kernel(x_ref, w_ref, b_ref, o_ref, *, relu):
    x = x_ref[...].astype(jnp.bfloat16)
    w = w_ref[...].astype(jnp.bfloat16)
    y = jnp.dot(x, w, preferred_element_type=jnp.float32) + b_ref[...]
    if relu:
        y = jnp.maximum(y, 0.0)
    o_ref[...] = y


def linear(x, w, b=None, relu=False, tm=512):
    """y = x @ w (+ b) [+ relu].  x: (M, Cin), w: (Cin, Cout)."""
    M, cin = x.shape
    cout = w.shape[1]
    if b is None:
        b = jnp.zeros((cout,), jnp.float32)
    tm = min(tm, _round_up(M, 8))
    Mp = _round_up(M, tm)
    xp = jnp.pad(x, ((0, Mp - M), (0, 0))) if Mp != M else x
    out = pl.pallas_call(
        functools.partial(_linear_kernel, relu=relu),
        out_shape=jax.ShapeDtypeStruct((Mp, cout), jnp.float32),
        grid=(Mp // tm,),
        in_specs=[
            pl.BlockSpec((tm, cin), lambda i: (i, 0)),
            pl.BlockSpec((cin, cout), lambda i: (0, 0)),
            pl.BlockSpec((1, cout), lambda i: (0, 0)),
        ],
        out_specs=pl.BlockSpec((tm, cout), lambda i: (i, 0)),
        compiler_params=pltpu.CompilerParams(dimension_semantics=("parallel",)),
    )(xp, w, b.reshape(1, cout))
    return out[:M]


# --------------------------------------------------------------------------
# Fused fc1 -> concatenated q/k/v projection (one matmul, lane width 3d)
# --------------------------------------------------------------------------
def _fc1_qkv_kernel(x_ref, w1_ref, b1_ref, wqkv_ref, o_ref):
    x = x_ref[...].astype(jnp.bfloat16)
    w1 = w1_ref[...].astype(jnp.bfloat16)
    h = jnp.dot(x, w1, preferred_element_type=jnp.float32) + b1_ref[...]
    o_ref[...] = jnp.dot(h.astype(jnp.bfloat16),
                         wqkv_ref[...].astype(jnp.bfloat16),
                         preferred_element_type=jnp.float32)


def fc1_qkv(x, w1, b1, wqkv, tm=512):
    M, cin = x.shape
    d = w1.shape[1]
    c3 = wqkv.shape[1]
    tm = min(tm, _round_up(M, 8))
    Mp = _round_up(M, tm)
    xp = jnp.pad(x, ((0, Mp - M), (0, 0))) if Mp != M else x
    out = pl.pallas_call(
        _fc1_qkv_kernel,
        out_shape=jax.ShapeDtypeStruct((Mp, c3), jnp.float32),
        grid=(Mp // tm,),
        in_specs=[
            pl.BlockSpec((tm, cin), lambda i: (i, 0)),
            pl.BlockSpec((cin, d), lambda i: (0, 0)),
            pl.BlockSpec((1, d), lambda i: (0, 0)),
            pl.BlockSpec((d, c3), lambda i: (0, 0)),
        ],
        out_specs=pl.BlockSpec((tm, c3), lambda i: (i, 0)),
        compiler_params=pltpu.CompilerParams(dimension_semantics=("parallel",)),
    )(xp, w1, b1.reshape(1, d), wqkv)
    return out[:M]


# --------------------------------------------------------------------------
# Fused g-branch: pos-MLP + (q - k + pos) MLP + softmax over K + aggregation
# --------------------------------------------------------------------------
def _pt_attn_kernel(q_ref, k_ref, v_ref, rel_ref,
                    d1w_ref, d1b_ref, d2w_ref, d2b_ref,
                    g1w_ref, g1b_ref, g2w_ref, g2b_ref,
                    o_ref, *, scale):
    tb, K, d = k_ref.shape

    def mm(x3, w_ref2, b_ref2):
        # (tb, K, din) @ (din, d) + (1, d)   -- bf16 MXU, f32 accumulation
        y = jnp.dot(x3.reshape(tb * K, x3.shape[-1]).astype(jnp.bfloat16),
                    w_ref2[...].astype(jnp.bfloat16),
                    preferred_element_type=jnp.float32)
        return y.reshape(tb, K, d) + b_ref2[...]

    rel = rel_ref[...]                                   # (tb, K, 3) f32
    d1w = d1w_ref[...]                                   # (3, d)
    # positional-MLP layer 1: contracting dim of 3 stays on the VPU.
    pos = (rel[..., 0:1] * d1w[0:1, :]
           + rel[..., 1:2] * d1w[1:2, :]
           + rel[..., 2:3] * d1w[2:3, :]
           + d1b_ref[...])
    pos = jnp.maximum(pos, 0.0)
    pos = mm(pos, d2w_ref, d2b_ref)                      # (tb, K, d)

    g = q_ref[...][:, None, :] - k_ref[...] + pos        # (tb, K, d)
    g = jnp.maximum(mm(g, g1w_ref, g1b_ref), 0.0)
    g = mm(g, g2w_ref, g2b_ref)

    s = g * scale
    m = jnp.max(s, axis=1, keepdims=True)
    e = jnp.exp(s - m)
    attn = e * pl.reciprocal(jnp.sum(e, axis=1, keepdims=True), approx=True)
    o_ref[...] = jnp.sum(attn * (v_ref[...] + pos), axis=1)   # (tb, d)


def pt_attention(q, k_nbr, v_nbr, rel, p, scale, tb=64):
    B, N, K, d = k_nbr.shape
    M = B * N
    tb = min(tb, _round_up(M, 8))
    Mp = _round_up(M, tb)
    qf = q.reshape(M, d)
    kf = k_nbr.reshape(M, K, d)
    vf = v_nbr.reshape(M, K, d)
    rf = rel.reshape(M, K, 3)
    if Mp != M:
        qf = jnp.pad(qf, ((0, Mp - M), (0, 0)))
        kf = jnp.pad(kf, ((0, Mp - M), (0, 0), (0, 0)))
        vf = jnp.pad(vf, ((0, Mp - M), (0, 0), (0, 0)))
        rf = jnp.pad(rf, ((0, Mp - M), (0, 0), (0, 0)))
    out = pl.pallas_call(
        functools.partial(_pt_attn_kernel, scale=scale),
        out_shape=jax.ShapeDtypeStruct((Mp, d), jnp.float32),
        grid=(Mp // tb,),
        in_specs=[
            pl.BlockSpec((tb, d), lambda i: (i, 0)),
            pl.BlockSpec((tb, K, d), lambda i: (i, 0, 0)),
            pl.BlockSpec((tb, K, d), lambda i: (i, 0, 0)),
            pl.BlockSpec((tb, K, 3), lambda i: (i, 0, 0)),
            pl.BlockSpec((3, d), lambda i: (0, 0)),
            pl.BlockSpec((1, d), lambda i: (0, 0)),
            pl.BlockSpec((d, d), lambda i: (0, 0)),
            pl.BlockSpec((1, d), lambda i: (0, 0)),
            pl.BlockSpec((d, d), lambda i: (0, 0)),
            pl.BlockSpec((1, d), lambda i: (0, 0)),
            pl.BlockSpec((d, d), lambda i: (0, 0)),
            pl.BlockSpec((1, d), lambda i: (0, 0)),
        ],
        out_specs=pl.BlockSpec((tb, d), lambda i: (i, 0)),
        compiler_params=pltpu.CompilerParams(dimension_semantics=("parallel",)),
    )(qf, kf, vf, rf,
      p["d1_w"], p["d1_b"].reshape(1, d),
      p["d2_w"], p["d2_b"].reshape(1, d),
      p["g1_w"], p["g1_b"].reshape(1, d),
      p["g2_w"], p["g2_b"].reshape(1, d))
    return out[:M].reshape(B, N, d)


# --------------------------------------------------------------------------
# Tiled training-mode BatchNorm1d: pass 1 accumulates sum/sumsq, pass 2 norm.
# --------------------------------------------------------------------------
def _bn_stats_kernel(x_ref, o_ref):
    @pl.when(pl.program_id(0) == 0)
    def _():
        o_ref[...] = jnp.zeros_like(o_ref)
    x = x_ref[...]
    both = jnp.concatenate(
        [jnp.sum(x, axis=0, keepdims=True),
         jnp.sum(x * x, axis=0, keepdims=True)], axis=0)
    o_ref[...] += both


def _bn_norm_kernel(x_ref, stats_ref, g_ref, b_ref, o_ref, *, inv_m, eps):
    stats = stats_ref[...]
    mean = stats[0:1, :] * inv_m
    var = stats[1:2, :] * inv_m - mean * mean          # biased, as in BN
    o_ref[...] = (x_ref[...] - mean) * jax.lax.rsqrt(var + eps) \
        * g_ref[...] + b_ref[...]


def batchnorm(x, gamma, beta, eps=1e-5, tm=512):
    """Training-mode BatchNorm1d over channel C of (B, N, C)."""
    B, N, C = x.shape
    M = B * N
    xf = x.reshape(M, C)
    tm = min(tm, _round_up(M, 8))
    Mp = _round_up(M, tm)
    xp = jnp.pad(xf, ((0, Mp - M), (0, 0))) if Mp != M else xf  # zero pad: sums exact
    stats = pl.pallas_call(
        _bn_stats_kernel,
        out_shape=jax.ShapeDtypeStruct((2, C), jnp.float32),
        grid=(Mp // tm,),
        in_specs=[pl.BlockSpec((tm, C), lambda i: (i, 0))],
        out_specs=pl.BlockSpec((2, C), lambda i: (0, 0)),
        compiler_params=pltpu.CompilerParams(dimension_semantics=("arbitrary",)),
    )(xp)
    out = pl.pallas_call(
        functools.partial(_bn_norm_kernel, inv_m=1.0 / M, eps=eps),
        out_shape=jax.ShapeDtypeStruct((Mp, C), jnp.float32),
        grid=(Mp // tm,),
        in_specs=[
            pl.BlockSpec((tm, C), lambda i: (i, 0)),
            pl.BlockSpec((2, C), lambda i: (0, 0)),
            pl.BlockSpec((1, C), lambda i: (0, 0)),
            pl.BlockSpec((1, C), lambda i: (0, 0)),
        ],
        out_specs=pl.BlockSpec((tm, C), lambda i: (i, 0)),
        compiler_params=pltpu.CompilerParams(dimension_semantics=("parallel",)),
    )(xp, stats, gamma.reshape(1, C), beta.reshape(1, C))
    return out[:M].reshape(B, N, C)


# --------------------------------------------------------------------------
# Pairwise squared distance, tiled over query rows
# --------------------------------------------------------------------------
def _sqdist_kernel(xq_ref, xk_ref, ksq_ref, o_ref):
    xq = xq_ref[0]                                       # (tq, 3)
    xk = xk_ref[0]                                       # (N, 3)
    qq = jnp.sum(xq * xq, axis=-1, keepdims=True)        # (tq, 1)
    cross = jax.lax.dot_general(xq, xk, (((1,), (1,)), ((), ())),
                                preferred_element_type=jnp.float32)  # (tq, N)
    o_ref[0] = qq + ksq_ref[0] - 2.0 * cross


def pairwise_sqdist(xyz, tq=256):
    """square_distance(xyz, xyz): (B, N, 3) -> (B, N, N)."""
    B, N, C = xyz.shape
    tq = min(tq, _round_up(N, 8))
    Np = _round_up(N, tq)
    xq = jnp.pad(xyz, ((0, 0), (0, Np - N), (0, 0))) if Np != N else xyz
    ksq = jnp.sum(xyz * xyz, axis=-1)[:, None, :]        # (B, 1, N)
    out = pl.pallas_call(
        _sqdist_kernel,
        out_shape=jax.ShapeDtypeStruct((B, Np, N), jnp.float32),
        grid=(B, Np // tq),
        in_specs=[
            pl.BlockSpec((1, tq, C), lambda b, i: (b, i, 0)),
            pl.BlockSpec((1, N, C), lambda b, i: (b, 0, 0)),
            pl.BlockSpec((1, 1, N), lambda b, i: (b, 0, 0)),
        ],
        out_specs=pl.BlockSpec((1, tq, N), lambda b, i: (b, i, 0)),
        compiler_params=pltpu.CompilerParams(
            dimension_semantics=("parallel", "parallel")),
    )(xq, xyz, ksq)
    return out[:, :N, :]


# --------------------------------------------------------------------------
# JAX glue: k-NN gather + point-transformer layer + encoder forward
# --------------------------------------------------------------------------
def index_points(points, idx):
    # points (B, N, C), idx (B, S, K) -> (B, S, K, C)
    return jax.vmap(lambda p, i: p[i])(points, idx)


def pt_layer_forward(p, feats, xyz, knn_idx, knn_xyz):
    B, N, cin = feats.shape
    d = p["fc1_w"].shape[1]
    M = B * N

    # fused fc1 + q/k/v projection (single pallas_call, 3d-wide output)
    wqkv = jnp.concatenate([p["wq_w"], p["wk_w"], p["wv_w"]], axis=1)  # (d, 3d)
    qkv = fc1_qkv(feats.reshape(M, cin), p["fc1_w"], p["fc1_b"], wqkv)
    q, k, v = jnp.split(qkv, 3, axis=-1)
    q = q.reshape(B, N, d)
    k = k.reshape(B, N, d)
    v = v.reshape(B, N, d)

    # TODO(synk): neighbor gather kept as an XLA gather; an in-kernel
    # scalar-prefetch gather would avoid materializing the (B,N,K,d) slabs.
    k_nbr = index_points(k, knn_idx)                     # (B, N, K, d)
    v_nbr = index_points(v, knn_idx)                     # (B, N, K, d)
    rel = xyz[:, :, None, :] - knn_xyz                   # (B, N, K, 3)

    agg = pt_attention(q, k_nbr, v_nbr, rel, p, scale=1.0 / math.sqrt(d))
    res = linear(agg.reshape(M, d), p["fc2_w"], p["fc2_b"]).reshape(B, N, d)
    return res


def encoder_forward(xyz, params, k_neighbors=24):
    # with torch.no_grad():  (pure inference here)
    dists = pairwise_sqdist(xyz)
    _, knn_idx = jax.lax.top_k(-dists, k_neighbors)      # kNN (incl. self)
    knn_xyz = index_points(xyz, knn_idx)

    f1 = pt_layer_forward(params["tl1"], xyz, xyz, knn_idx, knn_xyz)
    f1 = batchnorm(f1, params["bn1"]["g"], params["bn1"]["b"])
    f2 = pt_layer_forward(params["tl2"], f1, xyz, knn_idx, knn_xyz)
    f2 = batchnorm(f2, params["bn2"]["g"], params["bn2"]["b"])
    f3 = pt_layer_forward(params["tl3"], f2, xyz, knn_idx, knn_xyz)
    f3 = batchnorm(f3, params["bn3"]["g"], params["bn3"]["b"])
    f4 = pt_layer_forward(params["tl4"], f3, xyz, knn_idx, knn_xyz)
    f4 = batchnorm(f4, params["bn4"]["g"], params["bn4"]["b"])

    rw, rb = params["res_fc"]
    B, N, _ = f2.shape
    f4 = f4 + linear(f2.reshape(B * N, -1), rw, rb).reshape(B, N, -1)
    return (f4, f4, f4)


# --------------------------------------------------------------------------
# Deterministic parameter init (shapes follow the module's __init__)
# --------------------------------------------------------------------------
def init_linear(key, fan_in, fan_out, bias=True):
    kw, kb = jax.random.split(key)
    bound = 1.0 / math.sqrt(fan_in)
    w = jax.random.uniform(kw, (fan_in, fan_out), jnp.float32, -bound, bound)
    b = (jax.random.uniform(kb, (fan_out,), jnp.float32, -bound, bound)
         if bias else None)
    return w, b


def init_pt_layer(key, d_in, d_out):
    ks = jax.random.split(key, 9)
    p = {}
    p["fc1_w"], p["fc1_b"] = init_linear(ks[0], d_in, d_out)
    p["wq_w"], _ = init_linear(ks[1], d_out, d_out, bias=False)
    p["wk_w"], _ = init_linear(ks[2], d_out, d_out, bias=False)
    p["wv_w"], _ = init_linear(ks[3], d_out, d_out, bias=False)
    p["d1_w"], p["d1_b"] = init_linear(ks[4], 3, d_out)
    p["d2_w"], p["d2_b"] = init_linear(ks[5], d_out, d_out)
    p["g1_w"], p["g1_b"] = init_linear(ks[6], d_out, d_out)
    p["g2_w"], p["g2_b"] = init_linear(ks[7], d_out, d_out)
    p["fc2_w"], p["fc2_b"] = init_linear(ks[8], d_out, d_out)
    return p


def init_encoder(key, ef_dim):
    ks = jax.random.split(key, 5)

    def bn(c):
        return {"g": jnp.ones((c,), jnp.float32), "b": jnp.zeros((c,), jnp.float32)}

    return {
        "tl1": init_pt_layer(ks[0], 3, ef_dim // 16), "bn1": bn(ef_dim // 16),
        "tl2": init_pt_layer(ks[1], ef_dim // 16, ef_dim // 8), "bn2": bn(ef_dim // 8),
        "tl3": init_pt_layer(ks[2], ef_dim // 8, ef_dim // 4), "bn3": bn(ef_dim // 4),
        "tl4": init_pt_layer(ks[3], ef_dim // 4, ef_dim), "bn4": bn(ef_dim),
        "res_fc": init_linear(ks[4], ef_dim // 8, ef_dim),
    }


# --------------------------------------------------------------------------
if __name__ == "__main__":
    B, N, EF_DIM, K = 2, 32, 32, 24          # N >= K required by the kNN
    key = jax.random.PRNGKey(0)
    kx, kp = jax.random.split(key)
    xyz = jax.random.normal(kx, (B, N, 3), jnp.float32)
    params = init_encoder(kp, EF_DIM)

    out = encoder_forward(xyz, params, k_neighbors=K)
    jax.block_until_ready(out)

    assert out[0].shape == (B, N, EF_DIM)
    assert len(out) == 3
    print("KERNEL_OK")
</pallas_src>

<mosaic_0001>
module attributes {stable_mosaic.version = 11 : i64} {
  func.func @_sqdist_kernel(%arg0: i32, %arg1: i32, %arg2: memref<1x32x3xf32, #tpu.memory_space<vmem>>, %arg3: memref<1x32x3xf32, #tpu.memory_space<vmem>>, %arg4: memref<1x1x32xf32, #tpu.memory_space<vmem>>, %arg5: memref<1x32x32xf32, #tpu.memory_space<vmem>>) attributes {dimension_semantics = [#tpu.dimension_semantics<parallel>, #tpu.dimension_semantics<parallel>], iteration_bounds = array<i64: 2, 1>, scalar_prefetch = 0 : i64, scratch_operands = 0 : i64, tpu.core_type = #tpu.core_type<tc>, window_params = [{transform_indices = @transform_0, window_bounds = array<i64: 1, 32, 3>}, {transform_indices = @transform_1, window_bounds = array<i64: 1, 32, 3>}, {transform_indices = @transform_2, window_bounds = array<i64: 1, 1, 32>}, {transform_indices = @transform_3, window_bounds = array<i64: 1, 32, 32>}]} {
    %c0 = arith.constant 0 : index
    %c0_0 = arith.constant 0 : index
    %c0_1 = arith.constant 0 : index
    %0 = vector.load %arg2[%c0, %c0_0, %c0_1] : memref<1x32x3xf32, #tpu.memory_space<vmem>>, vector<1x32x3xf32>
    %1 = vector.shape_cast %0 : vector<1x32x3xf32> to vector<32x3xf32>
    %c0_2 = arith.constant 0 : index
    %c0_3 = arith.constant 0 : index
    %c0_4 = arith.constant 0 : index
    %2 = vector.load %arg3[%c0_2, %c0_3, %c0_4] : memref<1x32x3xf32, #tpu.memory_space<vmem>>, vector<1x32x3xf32>
    %3 = vector.shape_cast %2 : vector<1x32x3xf32> to vector<32x3xf32>
    %4 = arith.mulf %1, %1 : vector<32x3xf32>
    %cst = arith.constant dense<0.000000e+00> : vector<32xf32>
    %5 = vector.multi_reduction <add>, %4, %cst [1] : vector<32x3xf32> to vector<32xf32>
    %6 = vector.shape_cast %5 : vector<32xf32> to vector<32x1xf32>
    %cst_5 = arith.constant dense<0.000000e+00> : vector<32x32xf32>
    %7 = tpu.matmul %1, %3, %cst_5 {dimension_numbers = #tpu.dot_dimension_numbers<[1], [1], [0], [0], [0, 0, 1, 0], [], []>} : vector<32x3xf32>, vector<32x3xf32>, vector<32x32xf32> -> vector<32x32xf32>
    %c0_6 = arith.constant 0 : index
    %c0_7 = arith.constant 0 : index
    %c0_8 = arith.constant 0 : index
    %8 = vector.load %arg4[%c0_6, %c0_7, %c0_8] : memref<1x1x32xf32, #tpu.memory_space<vmem>>, vector<1x1x32xf32>
    %9 = vector.shape_cast %8 : vector<1x1x32xf32> to vector<1x32xf32>
    %10 = vector.broadcast %6 : vector<32x1xf32> to vector<32x32xf32>
    %11 = vector.broadcast %9 : vector<1x32xf32> to vector<32x32xf32>
    %12 = arith.addf %10, %11 : vector<32x32xf32>
    %cst_9 = arith.constant 2.000000e+00 : f32
    %13 = vector.broadcast %cst_9 : f32 to vector<32x32xf32>
    %14 = arith.mulf %13, %7 : vector<32x32xf32>
    %15 = arith.subf %12, %14 : vector<32x32xf32>
    %c0_10 = arith.constant 0 : index
    %c0_11 = arith.constant 0 : index
    %c0_12 = arith.constant 0 : index
    %16 = vector.load %arg5[%c0_10, %c0_11, %c0_12] : memref<1x32x32xf32, #tpu.memory_space<vmem>>, vector<1x32x32xf32>
    %17 = vector.shape_cast %16 : vector<1x32x32xf32> to vector<32x32xf32>
    %18 = vector.shape_cast %15 : vector<32x32xf32> to vector<1x32x32xf32>
    tpu.vector_store %arg5[%c0_10, %c0_11, %c0_12], %18 {strides = array<i32>} : memref<1x32x32xf32, #tpu.memory_space<vmem>>, vector<1x32x32xf32>,
    return
  }
  func.func @transform_0(%arg0: i32, %arg1: i32) -> (i32, i32, i32) {
    %c0_i32 = arith.constant 0 : i32
    %c0_i32_0 = arith.constant 0 : i32
    return %arg0, %arg1, %c0_i32 : i32, i32, i32
  }
  func.func @transform_1(%arg0: i32, %arg1: i32) -> (i32, i32, i32) {
    %c0_i32 = arith.constant 0 : i32
    %c0_i32_0 = arith.constant 0 : i32
    %c0_i32_1 = arith.constant 0 : i32
    return %arg0, %c0_i32, %c0_i32_0 : i32, i32, i32
  }
  func.func @transform_2(%arg0: i32, %arg1: i32) -> (i32, i32, i32) {
    %c0_i32 = arith.constant 0 : i32
    %c0_i32_0 = arith.constant 0 : i32
    %c0_i32_1 = arith.constant 0 : i32
    return %arg0, %c0_i32, %c0_i32_0 : i32, i32, i32
  }
  func.func @transform_3(%arg0: i32, %arg1: i32) -> (i32, i32, i32) {
    %c0_i32 = arith.constant 0 : i32
    %c0_i32_0 = arith.constant 0 : i32
    return %arg0, %arg1, %c0_i32 : i32, i32, i32
  }
}

</mosaic_0001>

<bundles_post_ra>
// kernel: tpu_custom_call.1
= control target key start
LH: loop header
LB: loop body
LE: loop exit
PB: predicated region body
PF: predicated region fallthrough
CT: control target
= control target key end

     0   :  { %8 = vsyncpa [#allocation3], 0  ;;  %s881_s0 = inlined_call_operand.vmem [shape: f32[2,32,3], index: 0, kind: input, shape index: {}]   ;;  %s882_s1 = inlined_call_operand.vmem [shape: f32[2,32,3], index: 1, kind: input, shape index: {}]   ;;  %s883_s2 = inlined_call_operand.vmem [shape: f32[2,1,32], index: 2, kind: input, shape index: {}]   ;;  %s884_s3 = inlined_call_operand.hbm [shape: f32[2,32,32], index: 3, kind: output, shape index: {}]  }
   0x1   :  { %10 = vsyncpa [#allocation3 + $0x1], 0  ;;  %s723_s12 = smov 0   ;;  %s725_s13 = smov 0  }
   0x2   :  { %s727_s14 = smov 0   ;;  %s729_s15 = smov 0  }
   0x3   :  { %s731_s16 = smov 0   ;;  %s733_s17 = smov 0  }
   0x4 LB: > { %s508_s18 = sadd.s32 4294967295, %s698_s17   ;;  %s509_s19 = sadd.s32 4294967294, %s698_s17   ;;  %s698_s17 = sphi %s733_s17, %s16_s17   ;;  %s694_s16 = sphi %s731_s16, %s891_s16   ;;  %s690_s15 = sphi %s729_s15, %s890_s15   ;;  %s686_s14 = sphi %s727_s14, %s889_s14   ;;  %s682_s13 = sphi %s725_s13, %s888_s13   ;;  %s678_s12 = sphi %s723_s12, %s887_s12  }
   0x5   : > { %s28_s20 = sadd.s32 1, %s694_s16  ;;  %s117_s21 = sadd.s32 1, %s686_s14 }
   0x6   : > { %p30_p0 = scmp.ge.s32.totalorder %s28_s20, 2  ;;  %p127_p1 = scmp.ne.s32.totalorder %s686_s14, %s682_s13 }
   0x7   : > { %p128_p2 = scmp.eq.s32.totalorder %s508_s18, 1  ;;  %p133_p3 = scmp.ne.s32.totalorder %s682_s13, %s678_s12 }
   0x8   : > { %s893_s20 = smov (%p30_p0, %s28_s20), 0  ;;  %p134_p5 = scmp.eq.s32.totalorder %s509_s19, 1 }
   0x9   : > { %p763_p4 = por %p128_p2, %p127_p1  ;;  %s112_s23 = ssub.s32 %s694_s16, %s893_s20 }
   0xa   : > { %p512_p6 = scmp.ge.s32.totalorder %s698_s17, 1  ;;  %p115_p7 = scmp.eq.s32.totalorder %s112_s23, 0 }
   0xb   : > { %p770_p8 = por %p134_p5, %p133_p3  ;;  %p179_p9 = scmp.lt.s32.totalorder %s698_s17, 3 }
   0xc   : > { %s776_s25 = scalar_select %p115_p7, %s686_s14, %s117_s21  }
   0xd   : > { %p180_p10 = pnand %p512_p6, %p179_p9 }
   0xe   : > { %p216_p11 = scmp.lt.s32.totalorder (!%p180_p10), %s690_s15, 1  ;;  %s212_s7 = sand.u32 (!%p180_p10), 1, %s682_s13  }
   0xf   : > { %183 = sbr.rel (%p180_p10) target bundleno = 254 (0xfe), region = 32  ;;  %s513_s11 = sshll.u32 (!%p180_p10), %s212_s7, 5 }
  0x10   : > { %s214_s18 = scalar_lea.vmem (!%p180_p10), [#allocation2], %s513_s11  ;;  %s534_s21 = sshll.u32 (!%p180_p10), %s690_s15, 9 }
  0x11   : > { %s408_s19 = sshll.u32 (!%p180_p10), %s214_s18, 4  ;;  %s700_s29 = smov (!%p180_p10), [#allocation2]   ;;  %s832_s19 = int_to_ptr.vmem [resolvable:$true] %s408_s19 }
  0x12   : > { %s622_s28 = scalar_lea.vmem (!%p180_p10), %s832_s19, 512 }
  0x13   : > { %p623_p12 = scmp.ne.s32.totalorder (!%p180_p10), %s832_s19, %s622_s28 }
  0x14   : > { %s780_s26 = scalar_select %p216_p11, %s690_s15, 1  ;;  %vm246_vm0 = vcmask 23552   ;;  %vm387_vm1 = vcmask 261120  }
  0x15   : > { %s836_s15 = scalar_lea.sflag [#allocation3], %s212_s7  ;;  %p624_p13 = pnand %p623_p12, %p763_p4 }
  0x16   : > { %s532_s27 = sshll.u32 %s780_s26, 5  ;;  %s232_s10 = scalar_lea.vmem %s883_s2, %s780_s26 }
  0x17   : > { %s786_s30 = scalar_lea.vmem %s882_s1, %s532_s27  ;;  %s223_s6 = scalar_lea.vmem %s881_s0, %s532_s27  ;;  %v526_v20 = vld [vmem:[%s232_s10] ss:$0 sm:$0xff] }
  0x18   : > { %v241_v0 = vld [vmem:[%s786_s30 + $0x18] sm:$0xff]  ;;  %v240_v1 = vld [vmem:[%s786_s30 + $0x10] sm:$0xff]  ;;  %v234_v2 = vld [vmem:[%s223_s6] sm:$0xff]  ;;  %s830_s27 = scalar_lea.hbm %s884_s3, %s534_s21  ;;  %p625_p0 = pneg %p624_p13 }
  0x19   : > { %543 = vmatprep.subr.msk.mxu0 %vm246_vm0, %v241_v0  ;;  %557 = vmatprep.subr.msk.mxu1 %vm246_vm0, %v241_v0  ;;  %v236_v3 = vld [vmem:[%s223_s6 + $0x10] sm:$0xff]  ;;  %v242_v4 = vmul.f32 %v234_v2, %v234_v2  ;;  %v235_v6 = vld [vmem:[%s223_s6 + $0x8] sm:$0xff]  ;;  %v237_v7 = vld [vmem:[%s223_s6 + $0x18] sm:$0xff] }
  0x1a   : > { %544 = vmatpush3.xpose.msk.msra.mxu0 %vm246_vm0, %v241_v0  ;;  %561 = vmatpush3.xpose.msk.msra.mxu1 %vm246_vm0, %v241_v0  ;;  %v244_v5 = vmul.f32 %v236_v3, %v236_v3  ;;  %v245_v8 = vmul.f32 %v237_v7, %v237_v7  ;;  %v243_v9 = vmul.f32 %v235_v6, %v235_v6  ;;  %v239_v10 = vld [vmem:[%s786_s30 + $0x8] sm:$0xff]  ;;  %v238_v15 = vld [vmem:[%s786_s30] sm:$0xff]  ;;  %s626_s30 = sshll.u32 %s700_s29, 4  ;;  %s627_s30 = int_to_ptr.vmem [resolvable:$false] %s626_s30 }
  0x1b   : > { %545 = vmatprep.subr.msk.mxu0 %vm246_vm0, %v240_v1  ;;  %558 = vmatprep.subr.msk.mxu1 %vm246_vm0, %v240_v1  ;;  %v247_v12 = vsel %vm246_vm0, %v242_v4, 0.0  ;;  %s628_s4 = scalar_lea.vmem %s627_s30, 1024  ;;  %p629_p1 = scmp.lt.s32.totalorder %s832_s19, %s627_s30 }
  0x1c   : > { %551 = vmatprep.mubr.msk.f32.mxu0 %vm246_vm0, %v234_v2  ;;  %554 = vmatprep.mubr.msk.f32.mxu1 %vm246_vm0, %v236_v3  ;;  %v253_v11 = vsel %vm246_vm0, %v244_v5, 0.0  ;;  %v256_v13 = vsel %vm246_vm0, %v245_v8, 0.0  ;;  %v250_v14 = vsel %vm246_vm0, %v243_v9, 0.0  ;;  %p630_p2 = scmp.lt.s32.totalorder %s628_s4, %s622_s28 }
  0x1d   : > { %254 = vadd.xlane.f32.xlu1 %v253_v11  ;;  %248 = vadd.xlane.f32.xlu0 %v247_v12 }
  0x1e   : > { %546 = vmatpush3.xpose.msk.msra.mxu0 %vm246_vm0, %v240_v1  ;;  %562 = vmatpush3.xpose.msk.msra.mxu1 %vm246_vm0, %v240_v1  ;;  %p631_p3 = por %p630_p2, %p629_p1 }
  0x1f   : > { %547 = vmatprep.subr.msk.mxu0 %vm246_vm0, %v239_v10  ;;  %559 = vmatprep.subr.msk.mxu1 %vm246_vm0, %v239_v10 }
  0x20   : > { %p632_p5 = pnand %p631_p3, %p625_p0 }
  0x21   : > { %257 = vadd.xlane.f32.xlu1 %v256_v13  ;;  %251 = vadd.xlane.f32.xlu0 %v250_v14 }
  0x22   : > { %548 = vmatpush3.xpose.msk.msra.mxu0 %vm246_vm0, %v239_v10  ;;  %563 = vmatpush3.xpose.msk.msra.mxu1 %vm246_vm0, %v239_v10 }
  0x23   : > { %549 = vmatprep.subr.msk.mxu0 %vm246_vm0, %v238_v15  ;;  %560 = vmatprep.subr.msk.mxu1 %vm246_vm0, %v238_v15 }
  0x26   : > { %550 = vmatpush3.xpose.msk.msra.mxu0 %vm246_vm0, %v238_v15  ;;  %564 = vmatpush3.xpose.msk.msra.mxu1 %vm246_vm0, %v238_v15 }
  0x29   : > { %552 = vmatmul.mubr.msk.f32.vlgmr.msra.gmra.mxu0 %vm246_vm0, %v235_v6  ;;  %555 = vmatmul.mubr.msk.f32.vlgmr.msra.gmra.mxu1 %vm246_vm0, %v237_v7 }
  0xa6   : > { %v255_v16 = vpop.xlane.xlu1 %254  ;;  %v249_v17 = vpop.xlane.xlu0 %248 }
  0xa7   : > { %v377_v27 = vadd.f32 %v526_v20, %v255_v16  ;;  %v375_v28 = vadd.f32 %v526_v20, %v249_v17 }
  0xaa   : > { %v258_v18 = vpop.xlane.xlu1 %257  ;;  %v252_v19 = vpop.xlane.xlu0 %251 }
  0xab   : > { %v378_v21 = vadd.f32 %v526_v20, %v258_v18  ;;  %v376_v22 = vadd.f32 %v526_v20, %v252_v19 }
  0xe9   : > { %v556_v23 = vpop.f32.mrf.mxu1  ;;  %v553_v24 = vpop.f32.mrf.mxu0 }
  0xea   : > { %v382_v25 = vmul.f32 2.0, %v556_v23  ;;  %v380_v26 = vmul.f32 2.0, %v553_v24 }
  0xeb   : > { %v349_v29 = vpop.f32.mrf.mxu0  ;;  %v359_v30 = vpop.f32.mrf.mxu1 }
  0xec   : > { %v386_v31 = vsub.f32 %v378_v21, %v382_v25  ;;  %v384_v32 = vsub.f32 %v376_v22, %v380_v26  ;;  %v379_v33 = vmul.f32 2.0, %v349_v29  ;;  %v381_v34 = vmul.f32 2.0, %v359_v30 }
  0xee   : > { %391 = vst.msk [vmem:[%s214_s18 + $0x18] sm:$0xff] %vm387_vm1, %v386_v31  ;;  %389 = vst.msk [vmem:[%s214_s18 + $0x8] sm:$0xff] %vm387_vm1, %v384_v32  ;;  %v383_v35 = vsub.f32 %v375_v28, %v379_v33  ;;  %v385_v36 = vsub.f32 %v377_v27, %v381_v34 }
  0xf0   : > { %388 = vst.msk [vmem:[%s214_s18] sm:$0xff] %vm387_vm1, %v383_v35  ;;  %390 = vst.msk [vmem:[%s214_s18 + $0x10] sm:$0xff] %vm387_vm1, %v385_v36 }
  0xf1   : > { %635 = shalt.err (!%p632_p5)
}
  0xf2   : > { %s636_s5 = scalar_lea.hbm %s830_s27, 512  ;;  %s640_s8 = scalar_lea.hbm %s884_s3, 1024 }
  0xf3   : > { %p637_p6 = scmp.ne.s32.totalorder %s830_s27, %s636_s5  ;;  %p641_p10 = scmp.lt.s32.totalorder %s830_s27, %s884_s3 }
  0xf4   : > { %p642_p11 = scmp.lt.s32.totalorder %s640_s8, %s636_s5 }
  0xf5   : > { %p638_p7 = pnand %p637_p6, %p763_p4 }
  0xf6   : > { %p643_p12 = por %p642_p11, %p641_p10 }
  0xf7   : > { %p639_p9 = pneg %p638_p7 }
  0xf9   : > { %p644_p13 = pnand %p643_p12, %p639_p9 }
  0xfb   : > { %647 = shalt.err (!%p644_p13)
}
  0xfc   : > { %s701_s11 = smov 128   ;;  %s702_s18 = smov 8  }
  0xfd   : > { %565 = dma.vmem_to_hbm [thread:$0]  (%p763_p4), %s832_s19, 512, %s830_s27, %s836_s15, %s701_s11, %s701_s11, %s702_s18  }
  0xfe PF: > { %p571_p0 = scmp.ge.s32.totalorder %s698_s17, 2  ;;  %s423_s21 = sand.u32 1, %s678_s12  }
  0xff   : > { %s424_s23 = scalar_lea.sflag [#allocation3], %s423_s21 }
 0x100   : > { %p568_p1 = pnand %p571_p0, %p770_p8 }
 0x102   : > { %p569_p2 = pneg %p568_p1 }
 0x104   : > { %673 = dma.done.wait (%p569_p2), %s424_s23, 512  }
 0x105   : > { %675 = vsyncadd (%p569_p2), %s424_s23, 4294966784  ;;  %s16_s17 = sadd.s32 1, %s698_s17   ;;  %s887_s12 = smov %s682_s13 }
 0x106   : > { %p13_p3 = scmp.ge.s32.totalorder %s16_s17, 4   ;;  %s888_s13 = smov %s686_s14 }
 0x107   : > { %s889_s14 = smov %s776_s25  ;;  %s890_s15 = smov %s694_s16 }
 0x108   : > { %s891_s16 = smov %s893_s20  ;;  %15 = sbr.rel (!%p13_p3) target bundleno = 4 (0x4), region = 73 }
 0x10d   :  { %429 = vsyncpa [#allocation3], 1 }
 0x10e   :  { %431 = vsyncpa [#allocation3 + $0x1], 1 }

</bundles_post_ra>
